<compile_context>
chip_gen: v7x
topology: tpu7x:2x2x1
jax: 0.10.0
libtpu: 0.0.40
codegen_flags: <defaults>
</compile_context>

<pallas_src>
import jax
import jax.numpy as jnp
from jax.experimental import pallas as pl
from jax.experimental.pallas import tpu as pltpu

EPS = 1e-5  # nn.BatchNorm1d default eps

# NUM_CLS normally comes from taxonomy.csv; use a synthetic deterministic value.
# TODO(synk): real NUM_CLS is len(taxonomy.csv primary_label) — not loadable in-script.
NUM_CLS = 206


def _round_up(x, m):
    return ((x + m - 1) // m) * m


# --------------------------------------------------------------------------- #
# Kernel
# --------------------------------------------------------------------------- #
def make_mlp_kernel(num_layers):
    """Kernel for num_layers of (dot -> +bias), ReLU after all but the last.

    refs = (x, [w, b] * num_layers, out).  BN is already folded into (w, b);
    hidden weights are bf16, classifier weights are f32, biases are f32.
    """

    def kernel(*refs):
        x_ref = refs[0]
        o_ref = refs[-1]
        h = x_ref[...]                       # already bf16 (cast in wrapper)
        idx = 1
        for layer in range(num_layers):
            w_ref, b_ref = refs[idx], refs[idx + 1]
            idx += 2
            # MXU matmul with f32 accumulation; bias-add / ReLU stay in f32
            # (v5e has no bf16 VPU).
            acc = jnp.dot(h.astype(w_ref.dtype), w_ref[...],
                          preferred_element_type=jnp.float32)
            acc = acc + b_ref[...]
            if layer < num_layers - 1:
                h = jnp.maximum(acc, 0.0).astype(jnp.bfloat16)
            else:
                o_ref[...] = acc.astype(o_ref.dtype)   # lane-dense store
        # Dropout: identity in eval mode.

    return kernel


# --------------------------------------------------------------------------- #
# Parameter construction (synthetic, deterministic) and BN folding / padding
# --------------------------------------------------------------------------- #
def init_meta_mlp_params(key, in_dim, hidden_dims, num_cls):
    """Deterministic synthetic parameters matching MetaMLP.__init__ shapes.

    Weights are stored as [in, out] (transposed vs torch's [out, in]); 1-D
    params are stored as [1, dim] for lane-friendly broadcasting.
    """
    params = []
    dims = [in_dim] + list(hidden_dims)
    for i in range(len(hidden_dims)):
        k_w, k_m, k_v, key = jax.random.split(key, 4)
        fan_in, fan_out = dims[i], dims[i + 1]
        w = 0.02 * jax.random.normal(k_w, (fan_in, fan_out), jnp.float32)
        b = jnp.zeros((1, fan_out), jnp.float32)
        gamma = jnp.ones((1, fan_out), jnp.float32)
        beta = jnp.zeros((1, fan_out), jnp.float32)
        run_mean = 0.1 * jax.random.normal(k_m, (1, fan_out), jnp.float32)
        run_var = 0.5 + jnp.abs(jax.random.normal(k_v, (1, fan_out), jnp.float32))
        params += [w, b, gamma, beta, run_mean, run_var]
    k_w, key = jax.random.split(key)
    w_out = 0.02 * jax.random.normal(k_w, (dims[-1], num_cls), jnp.float32)
    b_out = jnp.zeros((1, num_cls), jnp.float32)
    params += [w_out, b_out]
    return params


def fold_params(raw_params, hidden_dims, num_cls):
    """Fold eval-mode BN into the preceding Linear, pad to lane-dense widths.

    Hidden dims are zero-padded up to multiples of 128 (cols of layer i, rows of
    layer i+1); classifier cols are zero-padded to a multiple of 128.  Padding
    is exact zeros, so padded activation columns are exactly zero and padded
    logit columns come out exactly zero.

    Returns [w_0, b_0, ..., w_out, b_out]: hidden w bf16, classifier w f32,
    biases f32.
    """
    folded = []
    idx = 0
    prev_pad = 0                                      # row padding for this layer's in-dim
    for h in hidden_dims:
        w, b, g, be, m, v = raw_params[idx:idx + 6]
        idx += 6
        scale = g * jax.lax.rsqrt(v + EPS)            # [1, out]
        w_f = w * scale                               # broadcast over in-dim
        b_f = (b - m) * scale + be
        hp = _round_up(h, 128)
        w_f = jnp.pad(w_f, ((0, prev_pad), (0, hp - h))).astype(jnp.bfloat16)
        b_f = jnp.pad(b_f, ((0, 0), (0, hp - h))).astype(jnp.float32)
        folded += [w_f, b_f]
        prev_pad = hp - h
    w_out, b_out = raw_params[idx], raw_params[idx + 1]
    ncp = _round_up(num_cls, 128)
    # Classifier kept in f32 (tiny; kernel is not MXU-bound) for tighter parity.
    w_out_p = jnp.pad(w_out, ((0, prev_pad), (0, ncp - num_cls))).astype(jnp.float32)
    b_out_p = jnp.pad(b_out, ((0, 0), (0, ncp - num_cls))).astype(jnp.float32)
    folded += [w_out_p, b_out_p]
    return folded


# --------------------------------------------------------------------------- #
# Wrapper
# --------------------------------------------------------------------------- #
def meta_mlp_forward(x, folded_params, num_cls, *, tile_b=None,
                     out_dtype=jnp.float32, slice_output=True):
    """Eval-mode forward pass.

    x: [B, in_dim] (f32 or bf16).  Returns [B, num_cls] (out_dtype) when
    slice_output=True, else the padded [B, num_cls_pad] logits (padded columns
    are exactly zero) so a downstream consumer inside the same jit can fuse the
    slice instead of paying an extra HBM round-trip.
    """
    B, in_dim = x.shape
    num_cls_pad = folded_params[-1].shape[-1]
    num_layers = len(folded_params) // 2

    # bf16 input: halves x DMA and avoids a per-tile f32->bf16 repack in-kernel.
    if x.dtype != jnp.bfloat16:
        x = x.astype(jnp.bfloat16)

    if tile_b is None:
        # Mem/overhead-bound: use big batch tiles (multiple of 16 for dense bf16
        # sublane packing), capped at 4096 (~18 MB VMEM incl. double-buffering,
        # fits v5e/v6e/v7x).  Clamp so the tile never exceeds the (8-rounded)
        # batch; ragged last tiles are handled by Pallas bounded edge-DMAs.
        tile_b = min(4096, _round_up(B, 16))
        tile_b = min(tile_b, _round_up(B, 8))
    tile_b = max(8, _round_up(tile_b, 8))

    grid = (pl.cdiv(B, tile_b),)   # no wrapper-side batch padding / row slicing

    x_spec = pl.BlockSpec((tile_b, in_dim), lambda i: (i, 0))
    # Weights/biases: full-array blocks, constant index map -> VMEM-resident
    # across all batch tiles.
    param_specs = [pl.BlockSpec(p.shape, lambda i: (0, 0)) for p in folded_params]
    out_spec = pl.BlockSpec((tile_b, num_cls_pad), lambda i: (i, 0))

    # Advisory cost estimate so XLA schedules neighbours around the call.
    flops = 0
    w_bytes = 0
    for li in range(num_layers):
        w = folded_params[2 * li]
        flops += 2 * B * w.shape[0] * w.shape[1]
        w_bytes += w.size * w.dtype.itemsize + folded_params[2 * li + 1].size * 4
    bytes_accessed = (B * in_dim * 2 + B * num_cls_pad * jnp.dtype(out_dtype).itemsize
                      + w_bytes)
    cost = pl.CostEstimate(flops=int(flops), transcendentals=0,
                           bytes_accessed=int(bytes_accessed))

    out = pl.pallas_call(
        make_mlp_kernel(num_layers),
        out_shape=jax.ShapeDtypeStruct((B, num_cls_pad), out_dtype),
        grid=grid,
        in_specs=[x_spec] + param_specs,
        out_specs=out_spec,
        compiler_params=pltpu.CompilerParams(
            dimension_semantics=("parallel",),        # batch tiles shard across TCs on v7x
            vmem_limit_bytes=48 * 1024 * 1024),       # headroom for 4096-row tiles
        cost_estimate=cost,
    )(x, *folded_params)

    if slice_output:
        return out[:, :num_cls]
    return out


# --------------------------------------------------------------------------- #
# Pure-JAX reference (un-folded, f32, eval-mode BN / identity dropout)
# --------------------------------------------------------------------------- #
def meta_mlp_reference(x, raw_params, hidden_dims):
    h = x
    idx = 0
    for _ in range(len(hidden_dims)):
        w, b, g, be, m, v = raw_params[idx:idx + 6]
        idx += 6
        h = h @ w + b
        h = (h - m) / jnp.sqrt(v + EPS) * g + be
        h = jnp.maximum(h, 0.0)
    w_out, b_out = raw_params[idx], raw_params[idx + 1]
    return h @ w_out + b_out


if __name__ == "__main__":
    key = jax.random.PRNGKey(0)
    k_x, k_p = jax.random.split(key)

    batch = 8
    in_dim = 32
    hidden_dims = [64, 32]
    dropout = 0.2  # identity in eval mode

    x = jax.random.normal(k_x, (batch, in_dim), jnp.float32)
    raw_params = init_meta_mlp_params(k_p, in_dim, hidden_dims, NUM_CLS)
    folded_params = fold_params(raw_params, hidden_dims, NUM_CLS)

    out = meta_mlp_forward(x, folded_params, NUM_CLS)
    out = jax.block_until_ready(out)

    ref = meta_mlp_reference(x, raw_params, hidden_dims)
    assert out.shape == (batch, NUM_CLS), out.shape
    # bf16 input / hidden weights with f32 accumulation -> slightly looser tolerance.
    assert jnp.allclose(out, ref, atol=2e-2, rtol=2e-2), "Pallas output mismatch vs reference"

    print("KERNEL_OK")
</pallas_src>

<mosaic_0001>
module attributes {stable_mosaic.version = 11 : i64} {
  func.func @kernel(%arg0: i32, %arg1: memref<8x32xbf16, #tpu.memory_space<vmem>>, %arg2: memref<32x128xbf16, #tpu.memory_space<vmem>>, %arg3: memref<1x128xf32, #tpu.memory_space<vmem>>, %arg4: memref<128x128xbf16, #tpu.memory_space<vmem>>, %arg5: memref<1x128xf32, #tpu.memory_space<vmem>>, %arg6: memref<128x256xf32, #tpu.memory_space<vmem>>, %arg7: memref<1x256xf32, #tpu.memory_space<vmem>>, %arg8: memref<8x256xf32, #tpu.memory_space<vmem>>) attributes {dimension_semantics = [#tpu.dimension_semantics<parallel>], iteration_bounds = array<i64: 1>, scalar_prefetch = 0 : i64, scratch_operands = 0 : i64, tpu.core_type = #tpu.core_type<tc>, window_params = [{transform_indices = @transform_0, window_bounds = array<i64: 8, 32>}, {pipeline_mode = #tpu.pipeline_mode<synchronous>, transform_indices = @transform_1, window_bounds = array<i64: 32, 128>}, {pipeline_mode = #tpu.pipeline_mode<synchronous>, transform_indices = @transform_2, window_bounds = array<i64: 1, 128>}, {pipeline_mode = #tpu.pipeline_mode<synchronous>, transform_indices = @transform_3, window_bounds = array<i64: 128, 128>}, {pipeline_mode = #tpu.pipeline_mode<synchronous>, transform_indices = @transform_4, window_bounds = array<i64: 1, 128>}, {pipeline_mode = #tpu.pipeline_mode<synchronous>, transform_indices = @transform_5, window_bounds = array<i64: 128, 256>}, {pipeline_mode = #tpu.pipeline_mode<synchronous>, transform_indices = @transform_6, window_bounds = array<i64: 1, 256>}, {transform_indices = @transform_7, window_bounds = array<i64: 8, 256>}]} {
    %c0 = arith.constant 0 : index
    %c0_0 = arith.constant 0 : index
    %0 = vector.load %arg1[%c0, %c0_0] : memref<8x32xbf16, #tpu.memory_space<vmem>>, vector<8x32xbf16>
    %c0_1 = arith.constant 0 : index
    %c0_2 = arith.constant 0 : index
    %1 = vector.load %arg2[%c0_1, %c0_2] : memref<32x128xbf16, #tpu.memory_space<vmem>>, vector<32x128xbf16>
    %cst = arith.constant dense<0.000000e+00> : vector<8x128xf32>
    %2 = tpu.matmul %0, %1, %cst {dimension_numbers = #tpu.dot_dimension_numbers<[1], [0], [0], [1], [0, 0, 1, 1], [], []>} : vector<8x32xbf16>, vector<32x128xbf16>, vector<8x128xf32> -> vector<8x128xf32>
    %c0_3 = arith.constant 0 : index
    %c0_4 = arith.constant 0 : index
    %3 = vector.load %arg3[%c0_3, %c0_4] : memref<1x128xf32, #tpu.memory_space<vmem>>, vector<1x128xf32>
    %4 = vector.broadcast %3 : vector<1x128xf32> to vector<8x128xf32>
    %5 = arith.addf %2, %4 : vector<8x128xf32>
    %cst_5 = arith.constant 0.000000e+00 : f32
    %6 = vector.broadcast %cst_5 : f32 to vector<8x128xf32>
    %7 = arith.maximumf %5, %6 : vector<8x128xf32>
    %8 = arith.truncf %7 : vector<8x128xf32> to vector<8x128xbf16>
    %c0_6 = arith.constant 0 : index
    %c0_7 = arith.constant 0 : index
    %9 = vector.load %arg4[%c0_6, %c0_7] : memref<128x128xbf16, #tpu.memory_space<vmem>>, vector<128x128xbf16>
    %cst_8 = arith.constant dense<0.000000e+00> : vector<8x128xf32>
    %10 = tpu.matmul %8, %9, %cst_8 {dimension_numbers = #tpu.dot_dimension_numbers<[1], [0], [0], [1], [0, 0, 1, 1], [], []>} : vector<8x128xbf16>, vector<128x128xbf16>, vector<8x128xf32> -> vector<8x128xf32>
    %c0_9 = arith.constant 0 : index
    %c0_10 = arith.constant 0 : index
    %11 = vector.load %arg5[%c0_9, %c0_10] : memref<1x128xf32, #tpu.memory_space<vmem>>, vector<1x128xf32>
    %12 = vector.broadcast %11 : vector<1x128xf32> to vector<8x128xf32>
    %13 = arith.addf %10, %12 : vector<8x128xf32>
    %cst_11 = arith.constant 0.000000e+00 : f32
    %14 = vector.broadcast %cst_11 : f32 to vector<8x128xf32>
    %15 = arith.maximumf %13, %14 : vector<8x128xf32>
    %16 = arith.truncf %15 : vector<8x128xf32> to vector<8x128xbf16>
    %17 = arith.extf %16 : vector<8x128xbf16> to vector<8x128xf32>
    %c0_12 = arith.constant 0 : index
    %c0_13 = arith.constant 0 : index
    %18 = vector.load %arg6[%c0_12, %c0_13] : memref<128x256xf32, #tpu.memory_space<vmem>>, vector<128x256xf32>
    %cst_14 = arith.constant dense<0.000000e+00> : vector<8x256xf32>
    %19 = tpu.matmul %17, %18, %cst_14 {dimension_numbers = #tpu.dot_dimension_numbers<[1], [0], [0], [1], [0, 0, 1, 1], [], []>} : vector<8x128xf32>, vector<128x256xf32>, vector<8x256xf32> -> vector<8x256xf32>
    %c0_15 = arith.constant 0 : index
    %c0_16 = arith.constant 0 : index
    %20 = vector.load %arg7[%c0_15, %c0_16] : memref<1x256xf32, #tpu.memory_space<vmem>>, vector<1x256xf32>
    %21 = vector.broadcast %20 : vector<1x256xf32> to vector<8x256xf32>
    %22 = arith.addf %19, %21 : vector<8x256xf32>
    %c0_17 = arith.constant 0 : index
    %c0_18 = arith.constant 0 : index
    %23 = vector.load %arg8[%c0_17, %c0_18] : memref<8x256xf32, #tpu.memory_space<vmem>>, vector<8x256xf32>
    tpu.vector_store %arg8[%c0_17, %c0_18], %22 {strides = array<i32>} : memref<8x256xf32, #tpu.memory_space<vmem>>, vector<8x256xf32>,
    return
  }
  func.func @transform_0(%arg0: i32) -> (i32, i32) {
    %c0_i32 = arith.constant 0 : i32
    %c0_i32_0 = arith.constant 0 : i32
    return %arg0, %c0_i32 : i32, i32
  }
  func.func @transform_1(%arg0: i32) -> (i32, i32) {
    %c0_i32 = arith.constant 0 : i32
    %c0_i32_0 = arith.constant 0 : i32
    %c0_i32_1 = arith.constant 0 : i32
    return %c0_i32, %c0_i32_0 : i32, i32
  }
  func.func @transform_2(%arg0: i32) -> (i32, i32) {
    %c0_i32 = arith.constant 0 : i32
    %c0_i32_0 = arith.constant 0 : i32
    %c0_i32_1 = arith.constant 0 : i32
    return %c0_i32, %c0_i32_0 : i32, i32
  }
  func.func @transform_3(%arg0: i32) -> (i32, i32) {
    %c0_i32 = arith.constant 0 : i32
    %c0_i32_0 = arith.constant 0 : i32
    %c0_i32_1 = arith.constant 0 : i32
    return %c0_i32, %c0_i32_0 : i32, i32
  }
  func.func @transform_4(%arg0: i32) -> (i32, i32) {
    %c0_i32 = arith.constant 0 : i32
    %c0_i32_0 = arith.constant 0 : i32
    %c0_i32_1 = arith.constant 0 : i32
    return %c0_i32, %c0_i32_0 : i32, i32
  }
  func.func @transform_5(%arg0: i32) -> (i32, i32) {
    %c0_i32 = arith.constant 0 : i32
    %c0_i32_0 = arith.constant 0 : i32
    %c0_i32_1 = arith.constant 0 : i32
    return %c0_i32, %c0_i32_0 : i32, i32
  }
  func.func @transform_6(%arg0: i32) -> (i32, i32) {
    %c0_i32 = arith.constant 0 : i32
    %c0_i32_0 = arith.constant 0 : i32
    %c0_i32_1 = arith.constant 0 : i32
    return %c0_i32, %c0_i32_0 : i32, i32
  }
  func.func @transform_7(%arg0: i32) -> (i32, i32) {
    %c0_i32 = arith.constant 0 : i32
    %c0_i32_0 = arith.constant 0 : i32
    return %arg0, %c0_i32 : i32, i32
  }
}

</mosaic_0001>

<bundles_post_ra>
// kernel: tpu_custom_call.1
= control target key start
LH: loop header
LB: loop body
LE: loop exit
PB: predicated region body
PF: predicated region fallthrough
CT: control target
= control target key end

     0   :  { %12 = vsyncpa [#allocation3], 0  ;;  %s749_s0 = inlined_call_operand.hbm [shape: bf16[8,32], index: 0, kind: input, shape index: {}]   ;;  %s750_s1 = inlined_call_operand.hbm [shape: bf16[32,128], index: 1, kind: input, shape index: {}]   ;;  %s751_s2 = inlined_call_operand.vmem [shape: f32[1,128], index: 2, kind: input, shape index: {}]   ;;  %s752_s3 = inlined_call_operand.hbm [shape: bf16[128,128], index: 3, kind: input, shape index: {}]   ;;  %s753_s4 = inlined_call_operand.vmem [shape: f32[1,128], index: 4, kind: input, shape index: {}]   ;;  %s754_s5 = inlined_call_operand.hbm [shape: f32[128,256], index: 5, kind: input, shape index: {}]   ;;  %s755_s6 = inlined_call_operand.vmem [shape: f32[1,256], index: 6, kind: input, shape index: {}]   ;;  %s756_s7 = inlined_call_operand.hbm [shape: f32[8,256], index: 7, kind: output, shape index: {}]  }
   0x1   :  { %13 = vsyncpa [#allocation6], 0 }
   0x2   :  { %14 = vsyncpa [#allocation9], 0 }
   0x3   :  { %15 = vsyncpa [#allocation4], 0  ;;  %s623_s24 = smov [#allocation5]   ;;  %s505_s28 = scalar_lea.hbm %s750_s1, 256 }
   0x4   :  { %s31_s25 = sshll.u32 %s623_s24, 4  ;;  %p506_p0 = scmp.ne.s32.totalorder %s750_s1, %s505_s28  ;;  %s32_s25 = int_to_ptr.vmem [resolvable:$true] %s31_s25 }
   0x5   :  { %p509_p1 = scmp.lt.u32.totalorder %s505_s28, %s750_s1 }
   0x7   :  { %p511_p2 = pnand %p509_p1, %p506_p0 }
   0x9   :  { %514 = shalt.err (!%p511_p2)
}
   0xa   :  { %s515_s10 = scalar_lea.vmem %s32_s25, 256  ;;  %p520_p4 = scmp.lt.s32.totalorder %s32_s25, %s32_s25 }
   0xb   :  { %p516_p3 = scmp.ne.s32.totalorder %s32_s25, %s515_s10  ;;  %p521_p5 = scmp.lt.s32.totalorder %s515_s10, %s515_s10 }
   0xd   :  { %p522_p6 = por %p521_p5, %p520_p4 }
   0xf   :  { %p523_p7 = pnand %p522_p6, %p516_p3 }
  0x11   :  { %526 = shalt.err (!%p523_p7)
}
  0x12   :  { %s624_s11 = smov 64   ;;  %s625_s12 = smov 4  }
  0x13   :  { %37 = dma.hbm_to_vmem [thread:$0]  %s750_s1, 256, %s32_s25, [#allocation6], %s624_s11, %s624_s11, %s625_s12  }
  0x14   :  { %s626_s15 = smov [#allocation2]   ;;  %s627_s17 = smov [#allocation7]  }
  0x15   :  { %s22_s16 = sshll.u32 %s626_s15, 4  ;;  %s45_s18 = sshll.u32 %s627_s17, 4  ;;  %s23_s16 = int_to_ptr.vmem [resolvable:$true] %s22_s16  ;;  %s46_s18 = int_to_ptr.vmem [resolvable:$true] %s45_s18 }
  0x16   :  { %s527_s21 = scalar_lea.hbm %s749_s0, 64 }
  0x17   :  { %p528_p8 = scmp.ne.s32.totalorder %s749_s0, %s527_s21  ;;  %p531_p9 = scmp.lt.u32.totalorder %s527_s21, %s749_s0 }
  0x19   :  { %p533_p10 = pnand %p531_p9, %p528_p8 }
  0x1b   :  { %536 = shalt.err (!%p533_p10)
}
  0x1c   :  { %s537_s1 = scalar_lea.vmem %s23_s16, 64  ;;  %p542_p12 = scmp.lt.s32.totalorder %s23_s16, %s23_s16 }
  0x1d   :  { %p538_p11 = scmp.ne.s32.totalorder %s23_s16, %s537_s1  ;;  %p543_p13 = scmp.lt.s32.totalorder %s537_s1, %s537_s1 }
  0x1f   :  { %p544_p0 = por %p543_p13, %p542_p12 }
  0x21   :  { %p545_p1 = pnand %p544_p0, %p538_p11 }
  0x23   :  { %548 = shalt.err (!%p545_p1)
}
  0x24   :  { %25 = dma.hbm_to_vmem [thread:$0]  %s749_s0, 64, %s23_s16, [#allocation3]  }
  0x25   :  { %s549_s30 = scalar_lea.hbm %s752_s3, 1024 }
  0x26   :  { %p550_p2 = scmp.ne.s32.totalorder %s752_s3, %s549_s30  ;;  %p553_p3 = scmp.lt.u32.totalorder %s549_s30, %s752_s3 }
  0x28   :  { %p555_p4 = pnand %p553_p3, %p550_p2 }
  0x2a   :  { %558 = shalt.err (!%p555_p4)
}
  0x2b   :  { %s559_s14 = scalar_lea.vmem %s46_s18, 1024  ;;  %p564_p6 = scmp.lt.s32.totalorder %s46_s18, %s46_s18 }
  0x2c   :  { %p560_p5 = scmp.ne.s32.totalorder %s46_s18, %s559_s14  ;;  %p565_p7 = scmp.lt.s32.totalorder %s559_s14, %s559_s14 }
  0x2e   :  { %p566_p8 = por %p565_p7, %p564_p6 }
  0x30   :  { %p567_p9 = pnand %p566_p8, %p560_p5 }
  0x32   :  { %570 = shalt.err (!%p567_p9)
}
  0x33   :  { %51 = dma.hbm_to_vmem [thread:$0]  %s752_s3, 1024, %s46_s18, [#allocation6], %s624_s11, %s624_s11, %s625_s12  }
  0x34   :  { %s628_s16 = smov [#allocation8]   ;;  %s571_s21 = scalar_lea.hbm %s754_s5, 4096 }
  0x35   :  { %s59_s17 = sshll.u32 %s628_s16, 4  ;;  %p572_p10 = scmp.ne.s32.totalorder %s754_s5, %s571_s21  ;;  %s60_s17 = int_to_ptr.vmem [resolvable:$true] %s59_s17 }
  0x36   :  { %p575_p11 = scmp.lt.u32.totalorder %s571_s21, %s754_s5 }
  0x38   :  { %p577_p12 = pnand %p575_p11, %p572_p10 }
  0x3a   :  { %580 = shalt.err (!%p577_p12)
}
  0x3b   :  { %s581_s1 = scalar_lea.vmem %s60_s17, 4096  ;;  %p586_p0 = scmp.lt.s32.totalorder %s60_s17, %s60_s17 }
  0x3c   :  { %p582_p13 = scmp.ne.s32.totalorder %s60_s17, %s581_s1  ;;  %p587_p1 = scmp.lt.s32.totalorder %s581_s1, %s581_s1 }
  0x3e   :  { %p588_p2 = por %p587_p1, %p586_p0 }
  0x40   :  { %p589_p3 = pnand %p588_p2, %p582_p13 }
  0x42   :  { %592 = shalt.err (!%p589_p3)
}
  0x43   :  { %s629_s3 = smov 256   ;;  %s630_s11 = smov 16  }
  0x44   :  { %65 = dma.hbm_to_vmem [thread:$0]  %s754_s5, 4096, %s60_s17, [#allocation9], %s629_s3, %s629_s3, %s630_s11  }
  0x45   :  { %615 = dma.done.wait [#allocation3], 64  }
  0x46   :  { %616 = vsyncadd [#allocation3], 4294967232 }
  0x47   :  { %617 = dma.done.wait [#allocation6], 1280  }
  0x48   :  { %618 = vsyncadd [#allocation6], 4294966016 }
  0x49   :  { %619 = dma.done.wait [#allocation9], 4096  }
  0x4a   :  { %620 = vsyncadd [#allocation9], 4294963200  ;;  %v631_v0 = vmov 0.0   ;;  %vm632_vm0 = vmmov 0   ;;  %v495_v1 = vld [vmem:[#allocation5] sm:$0xff]   ;;  %v496_v2 = vld [vmem:[#allocation5 + $0x8] sm:$0xff]  }
  0x4b   :  { %424 = vmatprep.subr.bf16.mxu0 %v631_v0  ;;  %428 = vmatprep.mubr.msk.bf16.mxu0 %vm632_vm0, %v631_v0  ;;  %v497_v3 = vld [vmem:[#allocation7] sm:$0xff]   ;;  %vm105_vm1 = vcmask 261120   ;;  %v498_v4 = vld [vmem:[#allocation7 + $0x8] sm:$0xff]   ;;  %v499_v6 = vld [vmem:[#allocation7 + $0x10] sm:$0xff]   ;;  %s633_s30 = smov [#allocation10]  }
  0x4c   :  { %432 = vmatprep.subr.bf16.mxu1 %v631_v0  ;;  %448 = vmatprep.mubr.msk.bf16.mxu1 %vm632_vm0, %v631_v0  ;;  %v81_v5 = vld [vmem:[#allocation2] sm:$0xf]  ;;  %v500_v7 = vld [vmem:[#allocation7 + $0x18] sm:$0xff]   ;;  %v501_v8 = vld [vmem:[#allocation7 + $0x20] sm:$0xff]   ;;  %s388_s8 = sshll.u32 %s633_s30, 4  ;;  %s389_s8 = int_to_ptr.vmem [resolvable:$true] %s388_s8 }
  0x4d   :  { %425 = vmatpush3.bf16.msra.mxu0 %v495_v1  ;;  %433 = vmatpush3.bf16.msra.mxu1 %v497_v3  ;;  %v502_v9 = vld [vmem:[#allocation7 + $0x28] sm:$0xff]   ;;  %v503_v10 = vld [vmem:[#allocation7 + $0x30] sm:$0xff]   ;;  %v504_v11 = vld [vmem:[#allocation7 + $0x38] sm:$0xff]   ;;  %p598_p5 = scmp.lt.s32.totalorder %s389_s8, %s389_s8 }
  0x4e   :  { %426 = vmatprep.subr.bf16.mxu0 %v631_v0  ;;  %434 = vmatprep.subr.bf16.mxu1 %v631_v0  ;;  %v266_v12 = vld [vmem:[#allocation8 + $0x8] sm:$0xff]  ;;  %v268_v13 = vld [vmem:[#allocation8 + $0x18] sm:$0xff]  ;;  %v265_v14 = vld [vmem:[#allocation8] sm:$0xff] }
  0x4f   :  { %v452_v15 = vpack.c.bf16 %v268_v13, %v266_v12  ;;  %v267_v16 = vld [vmem:[#allocation8 + $0x10] sm:$0xff]  ;;  %v270_v17 = vld [vmem:[#allocation8 + $0x28] sm:$0xff]  ;;  %v272_v18 = vld [vmem:[#allocation8 + $0x38] sm:$0xff] }
  0x50   :  { %v454_v19 = vpack.c.bf16 %v267_v16, %v265_v14  ;;  %v456_v20 = vpack.c.bf16 %v272_v18, %v270_v17  ;;  %v269_v21 = vld [vmem:[#allocation8 + $0x20] sm:$0xff]  ;;  %v271_v22 = vld [vmem:[#allocation8 + $0x30] sm:$0xff]  ;;  %v274_v23 = vld [vmem:[#allocation8 + $0x48] sm:$0xff] }
  0x51   :  { %427 = vmatpush3.bf16.msra.mxu0 %v496_v2  ;;  %435 = vmatpush3.bf16.msra.mxu1 %v498_v4  ;;  %v276_v24 = vld [vmem:[#allocation8 + $0x58] sm:$0xff]  ;;  %v458_v25 = vpack.c.bf16 %v271_v22, %v269_v21  ;;  %v273_v27 = vld [vmem:[#allocation8 + $0x40] sm:$0xff]  ;;  %v275_v28 = vld [vmem:[#allocation8 + $0x50] sm:$0xff] }
  0x52   :  { %436 = vmatprep.subr.bf16.mxu1 %v631_v0  ;;  %453 = vmatprep.subr.bf16.mxu0 %v452_v15  ;;  %v460_v26 = vpack.c.bf16 %v276_v24, %v274_v23  ;;  %v278_v29 = vld [vmem:[#allocation8 + $0x68] sm:$0xff]  ;;  %v280_v30 = vld [vmem:[#allocation8 + $0x78] sm:$0xff]  ;;  %v462_v31 = vpack.c.bf16 %v275_v28, %v273_v27  ;;  %v277_v33 = vld [vmem:[#allocation8 + $0x60] sm:$0xff] }
  0x53   :  { %v464_v32 = vpack.c.bf16 %v280_v30, %v278_v29  ;;  %v279_v34 = vld [vmem:[#allocation8 + $0x70] sm:$0xff]  ;;  %v282_v35 = vld [vmem:[#allocation8 + $0x88] sm:$0xff]  ;;  %v284_v36 = vld [vmem:[#allocation8 + $0x98] sm:$0xff] }
  0x54   :  { %429 = vmatmul.mubr.msk.bf16.vlgmr.msra.gmra.mrb[0].mxu0 %vm105_vm1, %v81_v5  ;;  %v466_v37 = vpack.c.bf16 %v279_v34, %v277_v33  ;;  %v468_v38 = vpack.c.bf16 %v284_v36, %v282_v35  ;;  %v281_v39 = vld [vmem:[#allocation8 + $0x80] sm:$0xff]  ;;  %v283_v40 = vld [vmem:[#allocation8 + $0x90] sm:$0xff]  ;;  %v286_v41 = vld [vmem:[#allocation8 + $0xa8] sm:$0xff] }
  0x55   :  { %373 = vmatprep.mubr.f32.mxu0 %v631_v0  ;;  %437 = vmatpush3.bf16.msra.mxu1 %v499_v6  ;;  %v288_v42 = vld [vmem:[#allocation8 + $0xb8] sm:$0xff]  ;;  %v470_v43 = vpack.c.bf16 %v283_v40, %v281_v39  ;;  %v285_v45 = vld [vmem:[#allocation8 + $0xa0] sm:$0xff]  ;;  %v287_v46 = vld [vmem:[#allocation8 + $0xb0] sm:$0xff] }
  0x56   :  { %438 = vmatprep.subr.bf16.mxu1 %v631_v0  ;;  %455 = vmatpush1.bf16.msra.mxu0 %v454_v19  ;;  %v472_v44 = vpack.c.bf16 %v288_v42, %v286_v41  ;;  %v290_v47 = vld [vmem:[#allocation8 + $0xc8] sm:$0xff]  ;;  %v292_v48 = vld [vmem:[#allocation8 + $0xd8] sm:$0xff]  ;;  %v474_v49 = vpack.c.bf16 %v287_v46, %v285_v45  ;;  %v289_v51 = vld [vmem:[#allocation8 + $0xc0] sm:$0xff] }
  0x57   :  { %457 = vmatprep.subr.bf16.mxu0 %v456_v20  ;;  %v476_v50 = vpack.c.bf16 %v292_v48, %v290_v47  ;;  %v291_v52 = vld [vmem:[#allocation8 + $0xd0] sm:$0xff]  ;;  %v399_v54 = vld [vmem:[%s751_s2] ss:$0 sm:$0xff]  ;;  %v296_v63 = vld [vmem:[#allocation8 + $0xf8] sm:$0xff] }
  0x58   :  { %v478_v53 = vpack.c.bf16 %v291_v52, %v289_v51  ;;  %v294_v62 = vld [vmem:[#allocation8 + $0xe8] sm:$0xff]  ;;  %v293_v1 = vld [vmem:[#allocation8 + $0xe0] sm:$0xff]  ;;  %v295_v2 = vld [vmem:[#allocation8 + $0xf0] sm:$0xff] }
  0x59   :  { %439 = vmatpush3.bf16.msra.mxu1 %v500_v7  ;;  %v482_v3 = vpack.c.bf16 %v295_v2, %v293_v1  ;;  %v403_v4 = vld [vmem:[%s753_s4] ss:$0 sm:$0xff]  ;;  %s593_s4 = scalar_lea.vmem %s389_s8, 256 }
  0x5a   :  { %440 = vmatprep.subr.bf16.mxu1 %v631_v0  ;;  %459 = vmatpush1.bf16.msra.mxu0 %v458_v25  ;;  %v297_v14 = vld [vmem:[%s755_s6] sm:$0x3]  ;;  %p594_p4 = scmp.ne.s32.totalorder %s389_s8, %s593_s4  ;;  %p599_p6 = scmp.lt.s32.totalorder %s593_s4, %s593_s4 }
  0x5b   :  { %461 = vmatprep.subr.bf16.mxu0 %v460_v26 }
  0x5c   :  { %p600_p7 = por %p599_p6, %p598_p5 }
  0x5d   :  { %441 = vmatpush3.bf16.msra.mxu1 %v501_v8 }
  0x5e   :  { %442 = vmatprep.subr.bf16.mxu1 %v631_v0  ;;  %463 = vmatpush1.bf16.msra.mxu0 %v462_v31  ;;  %p601_p8 = pnand %p600_p7, %p594_p4 }
  0x5f   :  { %465 = vmatprep.subr.bf16.mxu0 %v464_v32 }
  0x61   :  { %443 = vmatpush3.bf16.msra.mxu1 %v502_v9 }
  0x62   :  { %444 = vmatprep.subr.bf16.mxu1 %v631_v0  ;;  %467 = vmatpush1.bf16.msra.mxu0 %v466_v37 }
  0x63   :  { %469 = vmatprep.subr.bf16.mxu0 %v468_v38 }
  0x65   :  { %445 = vmatpush3.bf16.msra.mxu1 %v503_v10 }
  0x66   :  { %446 = vmatprep.subr.bf16.mxu1 %v631_v0  ;;  %471 = vmatpush1.bf16.msra.mxu0 %v470_v43  ;;  %v480_v0 = vpack.c.bf16 %v296_v63, %v294_v62 }
  0x67   :  { %473 = vmatprep.subr.bf16.mxu0 %v472_v44 }
  0x69   :  { %447 = vmatpush3.bf16.msra.mxu1 %v504_v11  ;;  %v299_v11 = vlaneseq }
  0x6a   :  { %475 = vmatpush1.bf16.msra.mxu0 %v474_v49 }
  0x6b   :  { %477 = vmatprep.subr.bf16.mxu0 %v476_v50  ;;  %v300_v12 = vshrl.u32 %v299_v11, 7 }
  0x6d   :  { %v301_v13 = vsub.s32 0, %v300_v12  ;;  %v305_v15 = vsub.s32 1, %v300_v12 }
  0x6e   :  { %479 = vmatpush1.bf16.msra.mxu0 %v478_v53 }
  0x6f   :  { %481 = vmatprep.subr.bf16.mxu0 %v480_v0  ;;  %v302_v16 = vrot.slane %v297_v14, %v301_v13  ;;  %v306_v17 = vrot.slane %v297_v14, %v305_v15 }
  0x72   :  { %483 = vmatpush1.bf16.msra.mxu0 %v482_v3 }
 0x127   :  { %v143_v55 = vpop.f32.mrb[0].mxu0 }
 0x128   :  { %v144_v56 = vadd.f32 %v399_v54, %v143_v55  ;;  %v430_v57 = vpop.f32.mrb[1].mxu0 }
 0x129   :  { %v146_v58 = vpop.f32.mrb[2].mxu0 }
 0x12a   :  { %v149_v59 = vmax.f32 %v144_v56, 0.0  ;;  %v431_v60 = vpop.f32.mrb[3].mxu0 }
 0x12c   :  { %v150_v61 = vpack.c.bf16 %v149_v59, %v149_v59 }
 0x12e   :  { %449 = vmatmul.mubr.bf16.vlgmr.msra.gmra.mrb[0].mxu1 %v150_v61 }
 0x201   :  { %v256_v5 = vpop.f32.mrb[0].mxu1 }
 0x202   :  { %v257_v6 = vadd.f32 %v403_v4, %v256_v5  ;;  %v450_v7 = vpop.f32.mrb[1].mxu1 }
 0x203   :  { %v259_v8 = vpop.f32.mrb[2].mxu1 }
 0x204   :  { %v262_v9 = vmax.f32 %v257_v6, 0.0  ;;  %v451_v10 = vpop.f32.mrb[3].mxu1 }
 0x206   :  { %374 = vmatmul.mubr.f32.vlgmr.msra.gmra.mrb[4].mxu0 %v262_v9 }
 0x2d9   :  { %v375_v18 = vpop.f32.mrb[4].mxu0 }
 0x2da   :  { %v376_v19 = vadd.f32 %v375_v18, %v302_v16  ;;  %v377_v20 = vpop.f32.mrb[5].mxu0 }
 0x2db   :  { %v378_v21 = vadd.f32 %v377_v20, %v306_v17 }
 0x2dc   :  { %380 = vst [vmem:[#allocation10] sm:$0xff] %v376_v19 }
 0x2dd   :  { %381 = vst [vmem:[#allocation10 + $0x8] sm:$0xff] %v378_v21 }
 0x2de   :  { %604 = shalt.err (!%p601_p8)
}
 0x2df   :  { %s605_s10 = scalar_lea.hbm %s756_s7, 256 }
 0x2e0   :  { %p606_p9 = scmp.ne.s32.totalorder %s756_s7, %s605_s10  ;;  %p609_p10 = scmp.lt.u32.totalorder %s605_s10, %s756_s7 }
 0x2e2   :  { %p611_p11 = pnand %p609_p10, %p606_p9 }
 0x2e4   :  { %614 = shalt.err (!%p611_p11)
}
 0x2e5   :  { %391 = dma.vmem_to_hbm [thread:$0]  %s389_s8, 256, %s756_s7, [#allocation4]  }
 0x2e6   :  { %621 = dma.done.wait [#allocation4], 256  }
 0x2e7   :  { %622 = vsyncadd [#allocation4], 4294967040 }
 0x2e8   :  { %395 = vsyncpa [#allocation3], 1 }
 0x2e9   :  { %396 = vsyncpa [#allocation6], 1 }
 0x2ea   :  { %397 = vsyncpa [#allocation9], 1 }
 0x2eb   :  { %398 = vsyncpa [#allocation4], 1 }

</bundles_post_ra>
